<compile_context>
chip_gen: v7x
topology: tpu7x:2x2x1
jax: 0.10.0
libtpu: 0.0.40
codegen_flags: <defaults>
</compile_context>

<pallas_src>
import functools

import jax
import jax.numpy as jnp
from jax import lax
from jax.experimental import pallas as pl
from jax.experimental.pallas import tpu as pltpu

F32 = jnp.float32
BF16 = jnp.bfloat16
_NORM_EPS = 1e-12


# ----------------------------- in-kernel helpers -----------------------------

def _leaky_relu(x, slope=0.2):
    return jnp.where(x >= 0, x, slope * x)


def _gelu_tanh(x):
    # tanh-based GELU runs on the EUP slot, keeping VALU free.
    # TODO(synk): torch.nn.GELU() default is erf-based; tanh approx differs by <~1e-3.
    c = 0.7978845608028654  # sqrt(2/pi)
    return 0.5 * x * (1.0 + jnp.tanh(c * (x + 0.044715 * x * x * x)))


def _l2norm_rows(x):
    # torch F.normalize clamps the norm; rsqrt(sum_sq + eps) is numerically equivalent here.
    return x * lax.rsqrt(jnp.sum(x * x, axis=-1, keepdims=True) + _NORM_EPS)


# -------------------- image encoder stub: linear + L2 norm --------------------

def _encode_image_kernel(x_ref, w_ref, b_ref, o_ref):
    y = jnp.dot(x_ref[...].astype(BF16), w_ref[...],
                preferred_element_type=F32) + b_ref[...]
    o_ref[...] = _l2norm_rows(y).astype(o_ref.dtype)


def encode_image(x_flat, w, b, *, tm=256):
    """l2norm(x @ w + b).  Full-K weight resident in VMEM: no K grid axis,
    no accumulator scratch, no padding.  M axis is 'parallel' (megacore)."""
    M, K = x_flat.shape
    N = w.shape[1]
    tm = M if M <= tm else tm
    return pl.pallas_call(
        _encode_image_kernel,
        out_shape=jax.ShapeDtypeStruct((M, N), BF16),   # bf16: feeds the logits MXU op
        grid_spec=pltpu.PrefetchScalarGridSpec(
            num_scalar_prefetch=0,
            grid=(pl.cdiv(M, tm),),
            in_specs=[pl.BlockSpec((tm, K), lambda i: (i, 0)),
                      pl.BlockSpec((K, N), lambda i: (0, 0)),
                      pl.BlockSpec((1, N), lambda i: (0, 0))],
            out_specs=pl.BlockSpec((tm, N), lambda i: (i, 0))),
        compiler_params=pltpu.CompilerParams(
            dimension_semantics=("parallel",),
            vmem_limit_bytes=32 * 1024 * 1024),
    )(x_flat, w, b)


# ------------- fused text path: encode_text stub + VAE + combine + logits -----

def _text_logits_kernel(img_ref, ttok_ref, ctok_ref,
                        w_txt_ref, b_txt_ref,
                        w_in_ref, b_in_ref, w_m_ref, b_m_ref, w_v_ref, b_v_ref,
                        w_out_ref, b_out_ref, eps_ref,
                        w_lin1_ref, w_lin2_ref, b_lin_ref, scale_ref,
                        logits_ref, loss_ref, *, n_p, n_cls):
    w_txt = w_txt_ref[...]
    b_txt = b_txt_ref[...]

    # Stub encode_text for templates and classes; shared weight stays resident,
    # two small matmuls avoid a non-sublane-aligned split of a merged result.
    tfeat = jnp.dot(ttok_ref[...].astype(BF16), w_txt, preferred_element_type=F32) + b_txt
    cfeat = jnp.dot(ctok_ref[...].astype(BF16), w_txt, preferred_element_type=F32) + b_txt

    # ---- VAE on template features (bf16 MXU operands, f32 element-wise) ----
    h = _leaky_relu(jnp.dot(tfeat.astype(BF16), w_in_ref[...],
                            preferred_element_type=F32) + b_in_ref[...])
    hb = h.astype(BF16)
    mean = jnp.dot(hb, w_m_ref[...], preferred_element_type=F32) + b_m_ref[...]
    log_var = jnp.dot(hb, w_v_ref[...], preferred_element_type=F32) + b_v_ref[...]
    z = mean + jnp.exp(0.5 * log_var) * eps_ref[...]
    x_hat = _leaky_relu(jnp.dot(z.astype(BF16), w_out_ref[...],
                                preferred_element_type=F32) + b_out_ref[...])
    # Loss matches the torch module: (x_hat - x)^2.sum(1).mean() + KLD (summed)
    diff = x_hat - tfeat
    rec = jnp.mean(jnp.sum(diff * diff, axis=1, keepdims=True))
    kld = -0.5 * jnp.sum(1.0 + log_var - mean * mean - jnp.exp(log_var))
    loss_ref[0, 0] = rec + kld

    # ---- UpdatedModel.linear split across the concat halves ----
    t_proj = jnp.dot(x_hat.astype(BF16), w_lin1_ref[...], preferred_element_type=F32)  # [n_p, ctx]
    c_proj = jnp.dot(cfeat.astype(BF16), w_lin2_ref[...], preferred_element_type=F32)  # [n_cls, ctx]

    # Row (i*n_p + j) of the text block needs t_proj[j] + c_proj[i] (matches
    # repeat/cat + .view(-1, ctx) in torch).  Replicate with tiny 0/1 selection
    # matmuls (MXU) — stays 2D / lane-dense, no 3D reshapes or repeats.
    n_txt = n_cls * n_p
    row_t = lax.broadcasted_iota(jnp.int32, (n_txt, n_p), 0)
    col_t = lax.broadcasted_iota(jnp.int32, (n_txt, n_p), 1)
    sel_t = (col_t == row_t % n_p).astype(BF16)
    row_c = lax.broadcasted_iota(jnp.int32, (n_txt, n_cls), 0)
    col_c = lax.broadcasted_iota(jnp.int32, (n_txt, n_cls), 1)
    sel_c = (col_c == row_c // n_p).astype(BF16)
    t_rep = jnp.dot(sel_t, t_proj.astype(BF16), preferred_element_type=F32)
    c_rep = jnp.dot(sel_c, c_proj.astype(BF16), preferred_element_type=F32)

    txt = _l2norm_rows(_gelu_tanh(t_rep + c_rep + b_lin_ref[...]))   # [n_txt, ctx]

    # logits = exp(logit_scale) * image_features @ text_features^T
    # (at real class counts, make n_txt a multiple of 128 for lane-dense stores)
    logits = lax.dot_general(img_ref[...], txt.astype(BF16),
                             dimension_numbers=(((1,), (1,)), ((), ())),
                             preferred_element_type=F32)
    logits_ref[...] = scale_ref[0, 0] * logits


def text_logits_fused(img_feat, template_tokens, class_tokens, params, eps, scale):
    n_p = template_tokens.shape[0]
    n_cls = class_tokens.shape[0]
    B = img_feat.shape[0]
    vmem = pl.BlockSpec(memory_space=pltpu.MemorySpace.VMEM)
    smem = pl.BlockSpec(memory_space=pltpu.MemorySpace.SMEM)
    vae = params["vae"]
    logits, loss = pl.pallas_call(
        functools.partial(_text_logits_kernel, n_p=n_p, n_cls=n_cls),
        out_shape=(jax.ShapeDtypeStruct((B, n_cls * n_p), F32),
                   jax.ShapeDtypeStruct((1, 1), F32)),
        in_specs=[vmem] * 17 + [smem],
        out_specs=(vmem, smem),
    )(img_feat, template_tokens, class_tokens,
      params["w_txt"], params["b_txt"],
      vae["w_in"], vae["b_in"], vae["w_m"], vae["b_m"], vae["w_v"], vae["b_v"],
      vae["w_out"], vae["b_out"], eps,
      params["w_lin1"], params["w_lin2"], params["b_lin"], scale)
    return logits, loss[0, 0]


# ------------------------------ params / forward ------------------------------

def _init_linear(key, din, dout, wdtype=BF16):
    kw, kb = jax.random.split(key)
    bound = 1.0 / float(din) ** 0.5
    w = jax.random.uniform(kw, (din, dout), F32, -bound, bound)   # stored [din, dout]
    b = jax.random.uniform(kb, (dout,), F32, -bound, bound)
    return w.astype(wdtype), b.reshape(1, dout)                   # biases stay f32


def init_params(key, img_flat_dim, tok_dim, ctx_dim, latent_dim):
    ks = jax.random.split(key, 8)
    w_img, b_img = _init_linear(ks[0], img_flat_dim, ctx_dim)     # stub encode_image
    w_txt, b_txt = _init_linear(ks[1], tok_dim, ctx_dim)          # stub encode_text
    # VAE(ctx, ctx, latent)
    w_in, b_in = _init_linear(ks[2], ctx_dim, ctx_dim)
    w_m, b_m = _init_linear(ks[3], ctx_dim, latent_dim)
    w_v, b_v = _init_linear(ks[4], ctx_dim, latent_dim)
    w_out, b_out = _init_linear(ks[5], latent_dim, ctx_dim)
    # UpdatedModel.linear: (2*ctx) -> ctx; rows [:ctx] multiply templates, [ctx:] classes
    w_lin, b_lin = _init_linear(ks[6], 2 * ctx_dim, ctx_dim)
    return {
        "w_img": w_img, "b_img": b_img,          # bf16 weights: halve HBM streaming
        "w_txt": w_txt, "b_txt": b_txt,
        "vae": {"w_in": w_in, "b_in": b_in, "w_m": w_m, "b_m": b_m,
                "w_v": w_v, "b_v": b_v, "w_out": w_out, "b_out": b_out},
        "w_lin1": w_lin[:ctx_dim], "w_lin2": w_lin[ctx_dim:], "b_lin": b_lin,
        "logit_scale": jnp.asarray(jnp.log(1.0 / 0.07), F32),     # CLIP init
    }


def custom_clip_forward(params, image, class_tokens, template_tokens, eps):
    """CustomCLIP.forward(image, labels=None, epoch=None) -> logits (+ vae_loss)."""
    B = image.shape[0]
    img_flat = image.reshape(B, -1)

    # TODO(synk): full frozen CLIP encoders replaced by deterministic linear stubs.
    image_features = encode_image(img_flat, params["w_img"], params["b_img"])

    scale = jnp.exp(params["logit_scale"]).reshape(1, 1)
    logits, vae_loss = text_logits_fused(image_features, template_tokens,
                                         class_tokens, params, eps, scale)
    return logits, vae_loss


# ----------------------------------- main -------------------------------------

if __name__ == "__main__":
    # Small, module-consistent shapes
    B, C, H, W = 2, 4, 16, 16          # image NCHW; flattened = 1024
    ctx_dim, latent_dim = 128, 32      # scaled-down from 1024/128 in the module
    tok_dim = 64                       # stub "tokenized" feature width
    n_cls, n_p = 3, 4                  # classes, templates

    key = jax.random.PRNGKey(0)
    k_par, k_img, k_cls, k_tmp, k_eps = jax.random.split(key, 5)

    params = init_params(k_par, C * H * W, tok_dim, ctx_dim, latent_dim)
    image = jax.random.normal(k_img, (B, C, H, W), F32)
    class_tokens = jax.random.normal(k_cls, (n_cls, tok_dim), F32)
    template_tokens = jax.random.normal(k_tmp, (n_p, tok_dim), F32)
    eps = jax.random.normal(k_eps, (n_p, latent_dim), F32)   # reparameterization noise

    logits, vae_loss = custom_clip_forward(params, image, class_tokens,
                                           template_tokens, eps)
    jax.block_until_ready((logits, vae_loss))

    assert logits.shape == (B, n_cls * n_p), logits.shape
    assert vae_loss.shape == (), vae_loss.shape
    assert bool(jnp.isfinite(logits).all()) and bool(jnp.isfinite(vae_loss))
    print("KERNEL_OK")
</pallas_src>

<mosaic_0001>
module attributes {stable_mosaic.version = 11 : i64} {
  func.func @_encode_image_kernel(%arg0: i32, %arg1: memref<2x1024xf32, #tpu.memory_space<vmem>>, %arg2: memref<1024x128xbf16, #tpu.memory_space<vmem>>, %arg3: memref<1x128xf32, #tpu.memory_space<vmem>>, %arg4: memref<2x128xbf16, #tpu.memory_space<vmem>>) attributes {dimension_semantics = [#tpu.dimension_semantics<parallel>], iteration_bounds = array<i64: 1>, scalar_prefetch = 0 : i64, scratch_operands = 0 : i64, tpu.core_type = #tpu.core_type<tc>, window_params = [{transform_indices = @transform_0, window_bounds = array<i64: 2, 1024>}, {pipeline_mode = #tpu.pipeline_mode<synchronous>, transform_indices = @transform_1, window_bounds = array<i64: 1024, 128>}, {pipeline_mode = #tpu.pipeline_mode<synchronous>, transform_indices = @transform_2, window_bounds = array<i64: 1, 128>}, {transform_indices = @transform_3, window_bounds = array<i64: 2, 128>}]} {
    %c0 = arith.constant 0 : index
    %c0_0 = arith.constant 0 : index
    %0 = vector.load %arg1[%c0, %c0_0] : memref<2x1024xf32, #tpu.memory_space<vmem>>, vector<2x1024xf32>
    %1 = arith.truncf %0 : vector<2x1024xf32> to vector<2x1024xbf16>
    %c0_1 = arith.constant 0 : index
    %c0_2 = arith.constant 0 : index
    %2 = vector.load %arg2[%c0_1, %c0_2] : memref<1024x128xbf16, #tpu.memory_space<vmem>>, vector<1024x128xbf16>
    %cst = arith.constant dense<0.000000e+00> : vector<2x128xf32>
    %3 = tpu.matmul %1, %2, %cst {dimension_numbers = #tpu.dot_dimension_numbers<[1], [0], [0], [1], [0, 0, 1, 1], [], []>} : vector<2x1024xbf16>, vector<1024x128xbf16>, vector<2x128xf32> -> vector<2x128xf32>
    %c0_3 = arith.constant 0 : index
    %c0_4 = arith.constant 0 : index
    %4 = vector.load %arg3[%c0_3, %c0_4] : memref<1x128xf32, #tpu.memory_space<vmem>>, vector<1x128xf32>
    %5 = vector.broadcast %4 : vector<1x128xf32> to vector<2x128xf32>
    %6 = arith.addf %3, %5 : vector<2x128xf32>
    %7 = arith.mulf %6, %6 : vector<2x128xf32>
    %cst_5 = arith.constant dense<0.000000e+00> : vector<2xf32>
    %8 = vector.multi_reduction <add>, %7, %cst_5 [1] : vector<2x128xf32> to vector<2xf32>
    %9 = vector.shape_cast %8 : vector<2xf32> to vector<2x1xf32>
    %cst_6 = arith.constant 9.99999996E-13 : f32
    %10 = vector.broadcast %cst_6 : f32 to vector<2x1xf32>
    %11 = arith.addf %9, %10 : vector<2x1xf32>
    %12 = math.rsqrt %11 : vector<2x1xf32>
    %13 = vector.broadcast %12 : vector<2x1xf32> to vector<2x128xf32>
    %14 = arith.mulf %6, %13 : vector<2x128xf32>
    %15 = arith.truncf %14 : vector<2x128xf32> to vector<2x128xbf16>
    %c0_7 = arith.constant 0 : index
    %c0_8 = arith.constant 0 : index
    %16 = vector.load %arg4[%c0_7, %c0_8] : memref<2x128xbf16, #tpu.memory_space<vmem>>, vector<2x128xbf16>
    tpu.vector_store %arg4[%c0_7, %c0_8], %15 {strides = array<i32>} : memref<2x128xbf16, #tpu.memory_space<vmem>>, vector<2x128xbf16>,
    return
  }
  func.func @transform_0(%arg0: i32) -> (i32, i32) {
    %c0_i32 = arith.constant 0 : i32
    %c0_i32_0 = arith.constant 0 : i32
    return %arg0, %c0_i32 : i32, i32
  }
  func.func @transform_1(%arg0: i32) -> (i32, i32) {
    %c0_i32 = arith.constant 0 : i32
    %c0_i32_0 = arith.constant 0 : i32
    %c0_i32_1 = arith.constant 0 : i32
    return %c0_i32, %c0_i32_0 : i32, i32
  }
  func.func @transform_2(%arg0: i32) -> (i32, i32) {
    %c0_i32 = arith.constant 0 : i32
    %c0_i32_0 = arith.constant 0 : i32
    %c0_i32_1 = arith.constant 0 : i32
    return %c0_i32, %c0_i32_0 : i32, i32
  }
  func.func @transform_3(%arg0: i32) -> (i32, i32) {
    %c0_i32 = arith.constant 0 : i32
    %c0_i32_0 = arith.constant 0 : i32
    return %arg0, %c0_i32 : i32, i32
  }
}

</mosaic_0001>

<bundles_post_ra>
// kernel: tpu_custom_call.1
= control target key start
LH: loop header
LB: loop body
LE: loop exit
PB: predicated region body
PF: predicated region fallthrough
CT: control target
= control target key end

     0   :  { %8 = vsyncpa [#allocation3], 0  ;;  %s1178_s0 = inlined_call_operand.hbm [shape: f32[2,1024], index: 0, kind: input, shape index: {}]   ;;  %s1179_s1 = inlined_call_operand.hbm [shape: bf16[1024,128], index: 1, kind: input, shape index: {}]   ;;  %s1180_s2 = inlined_call_operand.vmem [shape: f32[1,128], index: 2, kind: input, shape index: {}]   ;;  %s1181_s3 = inlined_call_operand.hbm [shape: bf16[2,128], index: 3, kind: output, shape index: {}]  }
   0x1   :  { %9 = vsyncpa [#allocation6], 0 }
   0x2   :  { %10 = vsyncpa [#allocation4], 0  ;;  %s1100_s12 = smov [#allocation2]   ;;  %s1101_s14 = smov [#allocation5]  }
   0x3   :  { %s17_s13 = sshll.u32 %s1100_s12, 4  ;;  %s26_s15 = sshll.u32 %s1101_s14, 4  ;;  %s18_s13 = int_to_ptr.vmem [resolvable:$true] %s17_s13  ;;  %s1126_s15 = int_to_ptr.vmem [resolvable:$true] %s26_s15 }
   0x4   :  { %s1028_s18 = scalar_lea.hbm %s1178_s0, 256 }
   0x5   :  { %p1029_p0 = scmp.ne.s32.totalorder %s1178_s0, %s1028_s18  ;;  %p1032_p1 = scmp.lt.u32.totalorder %s1028_s18, %s1178_s0 }
   0x7   :  { %p1034_p2 = pnand %p1032_p1, %p1029_p0 }
   0x9   :  { %1037 = shalt.err (!%p1034_p2)
}
   0xa   :  { %s1038_s23 = scalar_lea.vmem %s18_s13, 256  ;;  %p1043_p4 = scmp.lt.s32.totalorder %s18_s13, %s18_s13 }
   0xb   :  { %p1039_p3 = scmp.ne.s32.totalorder %s18_s13, %s1038_s23  ;;  %p1044_p5 = scmp.lt.s32.totalorder %s1038_s23, %s1038_s23 }
   0xd   :  { %p1045_p6 = por %p1044_p5, %p1043_p4 }
   0xf   :  { %p1046_p7 = pnand %p1045_p6, %p1039_p3 }
  0x11   :  { %1049 = shalt.err (!%p1046_p7)
}
  0x12   :  { %20 = dma.hbm_to_vmem [thread:$0]  %s1178_s0, 256, %s18_s13, [#allocation3]  }
  0x13   :  { %s1050_s28 = scalar_lea.hbm %s1179_s1, 8192 }
  0x14   :  { %p1051_p8 = scmp.ne.s32.totalorder %s1179_s1, %s1050_s28  ;;  %p1054_p9 = scmp.lt.u32.totalorder %s1050_s28, %s1179_s1 }
  0x16   :  { %p1056_p10 = pnand %p1054_p9, %p1051_p8 }
  0x18   :  { %1059 = shalt.err (!%p1056_p10)
}
  0x19   :  { %s1060_s6 = scalar_lea.vmem %s1126_s15, 8192  ;;  %p1065_p12 = scmp.lt.s32.totalorder %s1126_s15, %s1126_s15 }
  0x1a   :  { %p1061_p11 = scmp.ne.s32.totalorder %s1126_s15, %s1060_s6  ;;  %p1066_p13 = scmp.lt.s32.totalorder %s1060_s6, %s1060_s6 }
  0x1c   :  { %p1067_p0 = por %p1066_p13, %p1065_p12 }
  0x1e   :  { %p1068_p1 = pnand %p1067_p0, %p1061_p11 }
  0x20   :  { %1071 = shalt.err (!%p1068_p1)
}
  0x21   :  { %s1102_s0 = smov 64   ;;  %s1103_s7 = smov 4  }
  0x22   :  { %32 = dma.hbm_to_vmem [thread:$0]  %s1179_s1, 8192, %s1126_s15, [#allocation6], %s1102_s0, %s1102_s0, %s1103_s7  }
  0x23   :  { %1094 = dma.done.wait [#allocation3], 256  }
  0x24   :  { %1095 = vsyncadd [#allocation3], 4294967040 }
  0x25   :  { %1096 = dma.done.wait [#allocation6], 8192  }
  0x26   :  { %1097 = vsyncadd [#allocation6], 4294959104  ;;  %v960_v0 = vld [vmem:[#allocation5 + $0x40] sm:$0xff]   ;;  %v964_v4 = vld [vmem:[#allocation5 + $0x48] sm:$0xff]   ;;  %v1104_v22 = vmov 1983009808   ;;  %v50_v24 = vlaneseq }
  0x27   :  { %v961_v1 = vld [vmem:[#allocation5 + $0xc0] sm:$0xff]   ;;  %866 = vmatprep.subr.bf16.mxu0 %v960_v0  ;;  %v965_v5 = vld [vmem:[#allocation5 + $0xc8] sm:$0xff]   ;;  %v968_v8 = vld [vmem:[#allocation5 + $0x50] sm:$0xff]   ;;  %v48_v23 = vunpack.c.l.s4 %v1104_v22  ;;  %vm776_vm0 = vcmask 1041408  }
  0x28   :  { %v962_v2 = vld [vmem:[#allocation5] sm:$0xff]   ;;  %888 = vmatprep.subr.bf16.mxu1 %v961_v1  ;;  %v966_v6 = vld [vmem:[#allocation5 + $0x8] sm:$0xff]   ;;  %v969_v9 = vld [vmem:[#allocation5 + $0xd0] sm:$0xff]   ;;  %v51_v30 = vshrl.u32 %v50_v24, 7 }
  0x29   :  { %v963_v3 = vld [vmem:[#allocation5 + $0x80] sm:$0xff]   ;;  %867 = vmatpush3.bf16.msra.mxu0 %v962_v2  ;;  %v967_v7 = vld [vmem:[#allocation5 + $0x88] sm:$0xff]   ;;  %v970_v10 = vld [vmem:[#allocation5 + $0x10] sm:$0xff]   ;;  %v49_v29 = vunpack.c.0.s8 %v48_v23 }
  0x2a   :  { %889 = vmatpush3.bf16.msra.mxu1 %v963_v3  ;;  %868 = vmatprep.subr.bf16.mxu0 %v964_v4  ;;  %v971_v11 = vld [vmem:[#allocation5 + $0x90] sm:$0xff]   ;;  %v972_v12 = vld [vmem:[#allocation5 + $0x58] sm:$0xff]   ;;  %v976_v16 = vld [vmem:[#allocation5 + $0x60] sm:$0xff]  }
  0x2b   :  { %890 = vmatprep.subr.bf16.mxu1 %v965_v5  ;;  %v973_v13 = vld [vmem:[#allocation5 + $0xd8] sm:$0xff]   ;;  %v977_v17 = vld [vmem:[#allocation5 + $0xe0] sm:$0xff]   ;;  %v980_v20 = vld [vmem:[#allocation5 + $0x68] sm:$0xff]   ;;  %v1157_v35 = vsub.s32 %v49_v29, %v51_v30 }
  0x2c   :  { %v974_v14 = vld [vmem:[#allocation5 + $0x18] sm:$0xff]   ;;  %v978_v18 = vld [vmem:[#allocation5 + $0x20] sm:$0xff]   ;;  %v981_v21 = vld [vmem:[#allocation5 + $0xe8] sm:$0xff]  }
  0x2d   :  { %869 = vmatpush3.bf16.msra.mxu0 %v966_v6  ;;  %v975_v15 = vld [vmem:[#allocation5 + $0x98] sm:$0xff]   ;;  %v979_v19 = vld [vmem:[#allocation5 + $0xa0] sm:$0xff]   ;;  %v982_v25 = vld [vmem:[#allocation5 + $0x28] sm:$0xff]  }
  0x2e   :  { %891 = vmatpush3.bf16.msra.mxu1 %v967_v7  ;;  %870 = vmatprep.subr.bf16.mxu0 %v968_v8  ;;  %v983_v26 = vld [vmem:[#allocation5 + $0xa8] sm:$0xff]   ;;  %v984_v27 = vld [vmem:[#allocation5 + $0x70] sm:$0xff]   ;;  %v988_v33 = vld [vmem:[#allocation5 + $0x78] sm:$0xff]  }
  0x2f   :  { %892 = vmatprep.subr.bf16.mxu1 %v969_v9  ;;  %v985_v28 = vld [vmem:[#allocation5 + $0xf0] sm:$0xff]   ;;  %v989_v34 = vld [vmem:[#allocation5 + $0xf8] sm:$0xff]   ;;  %v993_v41 = vld [vmem:[#allocation5 + $0x140] sm:$0xff]  }
  0x30   :  { %v986_v31 = vld [vmem:[#allocation5 + $0x30] sm:$0xff]   ;;  %v990_v36 = vld [vmem:[#allocation5 + $0x38] sm:$0xff]   ;;  %v994_v42 = vld [vmem:[#allocation5 + $0x1c0] sm:$0xff]  }
  0x31   :  { %871 = vmatpush3.bf16.msra.mxu0 %v970_v10  ;;  %v987_v32 = vld [vmem:[#allocation5 + $0xb0] sm:$0xff]   ;;  %v991_v37 = vld [vmem:[#allocation5 + $0xb8] sm:$0xff]   ;;  %v995_v48 = vld [vmem:[#allocation5 + $0x100] sm:$0xff]  }
  0x32   :  { %893 = vmatpush3.bf16.msra.mxu1 %v971_v11  ;;  %872 = vmatprep.subr.bf16.mxu0 %v972_v12  ;;  %v42_v38 = vld [vmem:[#allocation2] sm:$0xff]  ;;  %v997_v50 = vld [vmem:[#allocation5 + $0x148] sm:$0xff]   ;;  %v996_v52 = vld [vmem:[#allocation5 + $0x180] sm:$0xff]  }
  0x33   :  { %894 = vmatprep.subr.bf16.mxu1 %v973_v13  ;;  %v53_v39 = vrot.slane %v42_v38, %v1157_v35  ;;  %v46_v40 = vcombine.high %v42_v38, %v42_v38  ;;  %v998_v53 = vld [vmem:[#allocation5 + $0x1c8] sm:$0xff]   ;;  %v1001_v55 = vld [vmem:[#allocation5 + $0x150] sm:$0xff]   ;;  %v1005_v59 = vld [vmem:[#allocation5 + $0x158] sm:$0xff]  }
  0x34   :  { %v999_v54 = vld [vmem:[#allocation5 + $0x108] sm:$0xff]   ;;  %v1002_v57 = vld [vmem:[#allocation5 + $0x1d0] sm:$0xff]   ;;  %v1006_v61 = vld [vmem:[#allocation5 + $0x1d8] sm:$0xff]  }
  0x35   :  { %873 = vmatpush3.bf16.msra.mxu0 %v974_v14  ;;  %v61_v43 = vcombine.high %v53_v39, %v53_v39  ;;  %v60_v44 = vrot.slane %v46_v40, %v1157_v35  ;;  %v88_v45 = vpack.c.bf16 %v53_v39, %v53_v39  ;;  %v1000_v56 = vld [vmem:[#allocation5 + $0x188] sm:$0xff]   ;;  %v1003_v58 = vld [vmem:[#allocation5 + $0x110] sm:$0xff]   ;;  %v1007_v62 = vld [vmem:[#allocation5 + $0x118] sm:$0xff]  }
  0x36   :  { %895 = vmatpush3.bf16.msra.mxu1 %v975_v15  ;;  %874 = vmatprep.subr.bf16.mxu0 %v976_v16  ;;  %v1004_v60 = vld [vmem:[#allocation5 + $0x190] sm:$0xff]   ;;  %v1009_v63 = vld [vmem:[#allocation5 + $0x160] sm:$0xff]   ;;  %v1008_v0 = vld [vmem:[#allocation5 + $0x198] sm:$0xff]  }
  0x37   :  { %896 = vmatprep.subr.bf16.mxu1 %v977_v17  ;;  %v89_v46 = vpack.c.bf16 %v61_v43, %v61_v43  ;;  %v62_v47 = vcombine.high %v60_v44, %v60_v44  ;;  %v90_v49 = vpack.c.bf16 %v60_v44, %v60_v44  ;;  %v1010_v1 = vld [vmem:[#allocation5 + $0x1e0] sm:$0xff]   ;;  %v1013_v3 = vld [vmem:[#allocation5 + $0x168] sm:$0xff]   ;;  %v1017_v7 = vld [vmem:[#allocation5 + $0x170] sm:$0xff]  }
  0x38   :  { %v1011_v2 = vld [vmem:[#allocation5 + $0x120] sm:$0xff]   ;;  %v1014_v5 = vld [vmem:[#allocation5 + $0x1e8] sm:$0xff]   ;;  %v1018_v9 = vld [vmem:[#allocation5 + $0x1f0] sm:$0xff]  }
  0x39   :  { %875 = vmatpush3.bf16.msra.mxu0 %v978_v18  ;;  %647 = vmatprep.mubr.bf16.mxu0 %v89_v46  ;;  %v91_v51 = vpack.c.bf16 %v62_v47, %v62_v47  ;;  %v1012_v4 = vld [vmem:[#allocation5 + $0x1a0] sm:$0xff]   ;;  %v1015_v6 = vld [vmem:[#allocation5 + $0x128] sm:$0xff]   ;;  %v1019_v10 = vld [vmem:[#allocation5 + $0x130] sm:$0xff]  }
  0x3a   :  { %897 = vmatpush3.bf16.msra.mxu1 %v979_v19  ;;  %876 = vmatprep.subr.bf16.mxu0 %v980_v20  ;;  %v1016_v8 = vld [vmem:[#allocation5 + $0x1a8] sm:$0xff]   ;;  %v1021_v11 = vld [vmem:[#allocation5 + $0x178] sm:$0xff]   ;;  %v1020_v12 = vld [vmem:[#allocation5 + $0x1b0] sm:$0xff]  }
  0x3b   :  { %898 = vmatprep.subr.bf16.mxu1 %v981_v21  ;;  %687 = vmatprep.mubr.bf16.mxu1 %v91_v51  ;;  %v1022_v13 = vld [vmem:[#allocation5 + $0x1f8] sm:$0xff]  }
  0x3c   :  { %v43_v14 = vld [vmem:[#allocation2 + $0x8] sm:$0xff] }
  0x3d   :  { %877 = vmatpush3.bf16.msra.mxu0 %v982_v25  ;;  %v1023_v15 = vld [vmem:[#allocation5 + $0x138] sm:$0xff]   ;;  %v70_v16 = vrot.slane %v43_v14, %v1157_v35  ;;  %v63_v17 = vcombine.high %v43_v14, %v43_v14 }
  0x3e   :  { %899 = vmatpush3.bf16.msra.mxu1 %v983_v26  ;;  %878 = vmatprep.subr.bf16.mxu0 %v984_v27  ;;  %v1024_v18 = vld [vmem:[#allocation5 + $0x1b8] sm:$0xff]   ;;  %v801_v27 = vld [vmem:[%s1180_s2] ss:$0 sm:$0xff]  ;;  %s1105_s2 = smov [#allocation7]  }
  0x3f   :  { %900 = vmatprep.subr.bf16.mxu1 %v985_v28  ;;  %v78_v19 = vcombine.high %v70_v16, %v70_v16  ;;  %v77_v20 = vrot.slane %v63_v17, %v1157_v35  ;;  %v92_v21 = vpack.c.bf16 %v70_v16, %v70_v16  ;;  %s791_s11 = sshll.u32 %s1105_s2, 4  ;;  %s792_s11 = int_to_ptr.vmem [resolvable:$true] %s791_s11 }
  0x40   :  { %s1072_s12 = scalar_lea.vmem %s792_s11, 16  ;;  %s1076_s13 = scalar_lea.vmem %s792_s11, 32 }
  0x41   :  { %879 = vmatpush3.bf16.msra.mxu0 %v986_v31  ;;  %v93_v22 = vpack.c.bf16 %v78_v19, %v78_v19  ;;  %v79_v23 = vcombine.high %v77_v20, %v77_v20  ;;  %v94_v24 = vpack.c.bf16 %v77_v20, %v77_v20  ;;  %p1073_p2 = scmp.ne.s32.totalorder %s792_s11, %s1072_s12  ;;  %p1077_p3 = scmp.lt.s32.totalorder %s792_s11, %s792_s11 }
  0x42   :  { %901 = vmatpush3.bf16.msra.mxu1 %v987_v32  ;;  %880 = vmatprep.subr.bf16.mxu0 %v988_v33  ;;  %p1078_p4 = scmp.lt.s32.totalorder %s1076_s13, %s1072_s12 }
  0x43   :  { %902 = vmatprep.subr.bf16.mxu1 %v989_v34  ;;  %v95_v25 = vpack.c.bf16 %v79_v23, %v79_v23 }
  0x44   :  { %p1079_p5 = por %p1078_p4, %p1077_p3 }
  0x45   :  { %881 = vmatpush3.bf16.msra.mxu0 %v990_v36 }
  0x46   :  { %903 = vmatpush3.bf16.msra.mxu1 %v991_v37  ;;  %910 = vmatprep.subr.bf16.mxu0 %v993_v41  ;;  %p1080_p6 = pnand %p1079_p5, %p1073_p2 }
  0x47   :  { %932 = vmatprep.subr.bf16.mxu1 %v994_v42 }
  0x48   :  { %648 = vmatmul.mubr.bf16.vlgmr.msra.gmra.mrb[0].mxu0 %v88_v45 }
  0x49   :  { %911 = vmatpush3.bf16.msra.mxu0 %v995_v48  ;;  %688 = vmatmul.mubr.bf16.vlgmr.msra.gmra.mrb[0].mxu1 %v90_v49 }
  0x4a   :  { %912 = vmatprep.subr.bf16.mxu0 %v997_v50  ;;  %933 = vmatpush3.bf16.msra.mxu1 %v996_v52 }
  0x4b   :  { %934 = vmatprep.subr.bf16.mxu1 %v998_v53  ;;  %727 = vmatprep.mubr.bf16.mxu0 %v93_v22 }
  0x4c   :  { %767 = vmatprep.mubr.bf16.mxu1 %v95_v25 }
  0x4d   :  { %913 = vmatpush3.bf16.msra.mxu0 %v999_v54 }
  0x4e   :  { %914 = vmatprep.subr.bf16.mxu0 %v1001_v55  ;;  %935 = vmatpush3.bf16.msra.mxu1 %v1000_v56 }
  0x4f   :  { %936 = vmatprep.subr.bf16.mxu1 %v1002_v57 }
  0x51   :  { %915 = vmatpush3.bf16.msra.mxu0 %v1003_v58 }
  0x52   :  { %916 = vmatprep.subr.bf16.mxu0 %v1005_v59  ;;  %937 = vmatpush3.bf16.msra.mxu1 %v1004_v60 }
  0x53   :  { %938 = vmatprep.subr.bf16.mxu1 %v1006_v61 }
  0x55   :  { %917 = vmatpush3.bf16.msra.mxu0 %v1007_v62 }
  0x56   :  { %918 = vmatprep.subr.bf16.mxu0 %v1009_v63  ;;  %939 = vmatpush3.bf16.msra.mxu1 %v1008_v0 }
  0x57   :  { %940 = vmatprep.subr.bf16.mxu1 %v1010_v1 }
  0x59   :  { %919 = vmatpush3.bf16.msra.mxu0 %v1011_v2 }
  0x5a   :  { %920 = vmatprep.subr.bf16.mxu0 %v1013_v3  ;;  %941 = vmatpush3.bf16.msra.mxu1 %v1012_v4 }
  0x5b   :  { %942 = vmatprep.subr.bf16.mxu1 %v1014_v5 }
  0x5d   :  { %921 = vmatpush3.bf16.msra.mxu0 %v1015_v6 }
  0x5e   :  { %922 = vmatprep.subr.bf16.mxu0 %v1017_v7  ;;  %943 = vmatpush3.bf16.msra.mxu1 %v1016_v8 }
  0x5f   :  { %944 = vmatprep.subr.bf16.mxu1 %v1018_v9 }
  0x61   :  { %923 = vmatpush3.bf16.msra.mxu0 %v1019_v10 }
  0x62   :  { %924 = vmatprep.subr.bf16.mxu0 %v1021_v11  ;;  %945 = vmatpush3.bf16.msra.mxu1 %v1020_v12 }
  0x63   :  { %946 = vmatprep.subr.bf16.mxu1 %v1022_v13 }
  0x65   :  { %925 = vmatpush3.bf16.msra.mxu0 %v1023_v15 }
  0x66   :  { %947 = vmatpush3.bf16.msra.mxu1 %v1024_v18 }
  0x68   :  { %728 = vmatmul.mubr.bf16.vlgmr.msra.gmra.mrb[4].mxu0 %v92_v21 }
  0x69   :  { %768 = vmatmul.mubr.bf16.vlgmr.msra.gmra.mrb[4].mxu1 %v94_v24 }
 0x11b   :  { %v882_v26 = vpop.f32.mrb[0].mxu0 }
 0x11c   :  { %v883_v28 = vpop.f32.mrb[1].mxu0  ;;  %v904_v29 = vpop.f32.mrb[0].mxu1 }
 0x11d   :  { %v884_v30 = vadd.f32 %v883_v28, %v882_v26  ;;  %v885_v31 = vpop.f32.mrb[2].mxu0  ;;  %v905_v32 = vpop.f32.mrb[1].mxu1 }
 0x11e   :  { %v886_v33 = vpop.f32.mrb[3].mxu0  ;;  %v906_v35 = vadd.f32 %v905_v32, %v904_v29  ;;  %v907_v36 = vpop.f32.mrb[2].mxu1 }
 0x11f   :  { %v650_v34 = vadd.f32 %v884_v30, %v801_v27  ;;  %v908_v37 = vpop.f32.mrb[3].mxu1 }
 0x121   :  { %v690_v38 = vadd.f32 %v906_v35, %v650_v34 }
 0x13b   :  { %v926_v39 = vpop.f32.mrb[4].mxu0 }
 0x13c   :  { %v927_v40 = vpop.f32.mrb[5].mxu0  ;;  %v948_v41 = vpop.f32.mrb[4].mxu1 }
 0x13d   :  { %v928_v42 = vadd.f32 %v927_v40, %v926_v39  ;;  %v929_v43 = vpop.f32.mrb[6].mxu0  ;;  %v949_v44 = vpop.f32.mrb[5].mxu1 }
 0x13e   :  { %v930_v45 = vpop.f32.mrb[7].mxu0  ;;  %v950_v47 = vadd.f32 %v949_v44, %v948_v41  ;;  %v951_v48 = vpop.f32.mrb[6].mxu1 }
 0x13f   :  { %v730_v46 = vadd.f32 %v928_v42, %v690_v38  ;;  %v952_v49 = vpop.f32.mrb[7].mxu1 }
 0x141   :  { %v770_v50 = vadd.f32 %v950_v47, %v730_v46 }
 0x143   :  { %v775_v51 = vmul.f32 %v770_v50, %v770_v50 }
 0x145   :  { %v777_v52 = vsel %vm776_vm0, %v775_v51, 0.0 }
 0x146   :  { %778 = vadd.xlane.f32.xlu0 %v777_v52 }
 0x1d3   :  { %v779_v53 = vpop.xlane.xlu0 %778 }
 0x1d4   :  { %v780_v54 = vadd.f32 1e-12, %v779_v53 }
 0x1d6   :  { %1026 = vrsqrt.f32 %v780_v54 }
 0x1e0   :  { %v1027_v55 = vpop.eup %1026 }
 0x1e1   :  { %v782_v56 = vmul.f32 %v1027_v55, %v770_v50 }
 0x1e3   :  { %v783_v57 = vpack.c.bf16 %v782_v56, %v782_v56 }
 0x1e5   :  { %784 = vst [vmem:[#allocation7] sm:$0x1] %v783_v57 }
 0x1e6   :  { %1083 = shalt.err (!%p1080_p6)
}
 0x1e7   :  { %s1084_s16 = scalar_lea.hbm %s1181_s3, 16 }
 0x1e8   :  { %p1085_p7 = scmp.ne.s32.totalorder %s1181_s3, %s1084_s16  ;;  %p1088_p8 = scmp.lt.u32.totalorder %s1084_s16, %s1181_s3 }
 0x1ea   :  { %p1090_p9 = pnand %p1088_p8, %p1085_p7 }
 0x1ec   :  { %1093 = shalt.err (!%p1090_p9)
}
 0x1ed   :  { %794 = dma.vmem_to_hbm [thread:$0]  %s792_s11, 16, %s1181_s3, [#allocation4]  }
 0x1ee   :  { %1098 = dma.done.wait [#allocation4], 16  }
 0x1ef   :  { %1099 = vsyncadd [#allocation4], 4294967280 }
 0x1f0   :  { %798 = vsyncpa [#allocation3], 1 }
 0x1f1   :  { %799 = vsyncpa [#allocation6], 1 }
 0x1f2   :  { %800 = vsyncpa [#allocation4], 1 }

</bundles_post_ra>
